<compile_context>
chip_gen: v5e
topology: v5e:2x2
jax: 0.10.0
libtpu: 0.0.40
codegen_flags: <defaults>
</compile_context>

<pallas_src>
import functools

import jax
import jax.numpy as jnp
from jax.experimental import pallas as pl
from jax.experimental.pallas import tpu as pltpu


def _deepnn_fused_kernel(x_ref, w0_ref, b0_ref, wh_ref, bh_ref, wc_ref, bc_ref,
                         o_ref, *, num_stacked_hidden: int):
    """Whole MLP in a single kernel invocation (no intermediate HBM traffic)."""
    # Layer 0: (M, K_in) @ (K_in, H) + b0, ReLU.  f32 accumulation on the MXU.
    h = jnp.dot(x_ref[...], w0_ref[...], preferred_element_type=jnp.float32)
    h = jnp.maximum(h + b0_ref[...], 0.0)          # (1, H) broadcasts over rows

    # Hidden stack: identical (H, H) layers.  Static (unrolled) loop, static
    # integer indexing into the stacked refs -> pure VMEM views, activation
    # ping-pongs entirely on-chip.
    for i in range(num_stacked_hidden):
        h = jnp.dot(h, wh_ref[i], preferred_element_type=jnp.float32)
        h = jnp.maximum(h + bh_ref[i], 0.0)

    # Classifier.  Weights/bias are zero-padded to 128 lanes so this store is
    # an unmasked, lane-dense vst; the wrapper slices back to N_out.
    y = jnp.dot(h, wc_ref[...], preferred_element_type=jnp.float32)
    o_ref[...] = (y + bc_ref[...]).astype(o_ref.dtype)


def pack_deepnn_params(params):
    """One-time packing of per-layer (w, b) params into kernel-ready arrays.

    params: list of (w, b) with w shaped (in_features, out_features).
    Returns a dict of arrays + static ints consumed by `deepnn_forward`.
    """
    assert len(params) >= 3, "expect first layer + >=1 stacked hidden + classifier"
    (w0, b0) = params[0]
    hidden = params[1:-1]
    (wc, bc) = params[-1]

    K_in, H = w0.shape
    N_out = wc.shape[1]
    L = len(hidden)

    # Stack the identical hidden layers into single arrays (one DMA each).
    wh = jnp.stack([w for (w, _) in hidden])                 # (L, H, H)
    bh = jnp.stack([b.reshape(1, H) for (_, b) in hidden])   # (L, 1, H)
    b0_2d = b0.reshape(1, H)

    # Pad classifier output dim up to a multiple of 128 lanes (lane-dense store).
    N_pad = ((N_out + 127) // 128) * 128
    wc_p = jnp.zeros((H, N_pad), wc.dtype).at[:, :N_out].set(wc)
    bc_p = jnp.zeros((1, N_pad), bc.dtype).at[:, :N_out].set(bc)

    return dict(w0=w0, b0=b0_2d, wh=wh, bh=bh, wc=wc_p, bc=bc_p,
                K_in=K_in, H=H, N_out=N_out, N_pad=N_pad, L=L)


@functools.partial(jax.jit, static_argnames=("K_in", "H", "N_out", "N_pad", "L"))
def _deepnn_forward_impl(x, w0, b0, wh, bh, wc, bc, *, K_in, H, N_out, N_pad, L):
    M = x.shape[0]
    # Pad batch up to a multiple of 8 sublanes (min f32 tile height).
    M_pad = max(8, ((M + 7) // 8) * 8)
    if M_pad != M:
        x = jnp.zeros((M_pad, K_in), x.dtype).at[:M, :].set(x)

    out_padded = pl.pallas_call(
        functools.partial(_deepnn_fused_kernel, num_stacked_hidden=L),
        out_shape=jax.ShapeDtypeStruct((M_pad, N_pad), x.dtype),
        in_specs=[
            pl.BlockSpec((M_pad, K_in), lambda: (0, 0)),   # x
            pl.BlockSpec((K_in, H), lambda: (0, 0)),       # w0
            pl.BlockSpec((1, H), lambda: (0, 0)),          # b0
            pl.BlockSpec((L, H, H), lambda: (0, 0, 0)),    # stacked hidden W
            pl.BlockSpec((L, 1, H), lambda: (0, 0, 0)),    # stacked hidden b
            pl.BlockSpec((H, N_pad), lambda: (0, 0)),      # classifier W (padded)
            pl.BlockSpec((1, N_pad), lambda: (0, 0)),      # classifier b (padded)
        ],
        out_specs=pl.BlockSpec((M_pad, N_pad), lambda: (0, 0)),
        compiler_params=pltpu.CompilerParams(
            vmem_limit_bytes=8 * 1024 * 1024),  # ~650 KB weights << limit
    )(x, w0, b0, wh, bh, wc, bc)

    return out_padded[:M, :N_out]


def deepnn_forward(packed, x):
    """Fused forward pass mirroring DeepNN.forward with a single pallas_call."""
    return _deepnn_forward_impl(
        x, packed["w0"], packed["b0"], packed["wh"], packed["bh"],
        packed["wc"], packed["bc"],
        K_in=packed["K_in"], H=packed["H"], N_out=packed["N_out"],
        N_pad=packed["N_pad"], L=packed["L"])


def init_deepnn_params(key, input_size, output_size,
                       num_hidden_layers=10, hidden_layer_size=128):
    """Deterministic init matching the PyTorch module's layer shapes
    (nn.Linear default-style uniform init)."""
    params = []
    dims = [(input_size, hidden_layer_size)]
    for _ in range(num_hidden_layers - 1):
        dims.append((hidden_layer_size, hidden_layer_size))
    dims.append((hidden_layer_size, output_size))  # classifier
    for (fan_in, fan_out) in dims:
        key, kw, kb = jax.random.split(key, 3)
        bound = 1.0 / jnp.sqrt(jnp.float32(fan_in))
        w = jax.random.uniform(kw, (fan_in, fan_out), jnp.float32, -bound, bound)
        b = jax.random.uniform(kb, (fan_out,), jnp.float32, -bound, bound)
        params.append((w, b))
    return params


def deepnn_reference(params, x):
    h = x
    n_layers = len(params)
    for i, (w, b) in enumerate(params):
        h = h @ w + b
        if i != n_layers - 1:
            h = jnp.maximum(h, 0.0)
    return h


if __name__ == "__main__":
    batch = 8
    input_size = 32
    output_size = 16
    num_hidden_layers = 10
    hidden_layer_size = 128

    key = jax.random.PRNGKey(0)
    key, kx = jax.random.split(key)
    x = jax.random.normal(kx, (batch, input_size), jnp.float32)

    params = init_deepnn_params(key, input_size, output_size,
                                num_hidden_layers, hidden_layer_size)
    packed = pack_deepnn_params(params)

    out = jax.block_until_ready(deepnn_forward(packed, x))

    ref = deepnn_reference(params, x)
    assert out.shape == (batch, output_size)
    assert jnp.allclose(out, ref, atol=2e-4, rtol=2e-4), \
        float(jnp.max(jnp.abs(out - ref)))

    print("KERNEL_OK")
</pallas_src>

<mosaic_0001>
module attributes {stable_mosaic.version = 11 : i64} {
  func.func @_deepnn_fused_kernel(%arg0: memref<8x32xf32, #tpu.memory_space<vmem>>, %arg1: memref<32x128xf32, #tpu.memory_space<vmem>>, %arg2: memref<1x128xf32, #tpu.memory_space<vmem>>, %arg3: memref<9x128x128xf32, #tpu.memory_space<vmem>>, %arg4: memref<9x1x128xf32, #tpu.memory_space<vmem>>, %arg5: memref<128x128xf32, #tpu.memory_space<vmem>>, %arg6: memref<1x128xf32, #tpu.memory_space<vmem>>, %arg7: memref<8x128xf32, #tpu.memory_space<vmem>>) attributes {dimension_semantics = [], scalar_prefetch = 0 : i64, scratch_operands = 0 : i64, tpu.core_type = #tpu.core_type<tc>} {
    %c0 = arith.constant 0 : index
    %c0_0 = arith.constant 0 : index
    %0 = vector.load %arg0[%c0, %c0_0] : memref<8x32xf32, #tpu.memory_space<vmem>>, vector<8x32xf32>
    %c0_1 = arith.constant 0 : index
    %c0_2 = arith.constant 0 : index
    %1 = vector.load %arg1[%c0_1, %c0_2] : memref<32x128xf32, #tpu.memory_space<vmem>>, vector<32x128xf32>
    %cst = arith.constant dense<0.000000e+00> : vector<8x128xf32>
    %2 = tpu.matmul %0, %1, %cst {dimension_numbers = #tpu.dot_dimension_numbers<[1], [0], [0], [1], [0, 0, 1, 1], [], []>} : vector<8x32xf32>, vector<32x128xf32>, vector<8x128xf32> -> vector<8x128xf32>
    %c0_3 = arith.constant 0 : index
    %c0_4 = arith.constant 0 : index
    %3 = vector.load %arg2[%c0_3, %c0_4] : memref<1x128xf32, #tpu.memory_space<vmem>>, vector<1x128xf32>
    %4 = vector.broadcast %3 : vector<1x128xf32> to vector<8x128xf32>
    %5 = arith.addf %2, %4 : vector<8x128xf32>
    %cst_5 = arith.constant 0.000000e+00 : f32
    %6 = vector.broadcast %cst_5 : f32 to vector<8x128xf32>
    %7 = arith.maximumf %5, %6 : vector<8x128xf32>
    %c0_6 = arith.constant 0 : index
    %c0_7 = arith.constant 0 : index
    %c0_8 = arith.constant 0 : index
    %8 = vector.load %arg3[%c0_6, %c0_7, %c0_8] : memref<9x128x128xf32, #tpu.memory_space<vmem>>, vector<1x128x128xf32>
    %9 = vector.shape_cast %8 : vector<1x128x128xf32> to vector<128x128xf32>
    %cst_9 = arith.constant dense<0.000000e+00> : vector<8x128xf32>
    %10 = tpu.matmul %7, %9, %cst_9 {dimension_numbers = #tpu.dot_dimension_numbers<[1], [0], [0], [1], [0, 0, 1, 1], [], []>} : vector<8x128xf32>, vector<128x128xf32>, vector<8x128xf32> -> vector<8x128xf32>
    %c0_10 = arith.constant 0 : index
    %c0_11 = arith.constant 0 : index
    %c0_12 = arith.constant 0 : index
    %11 = vector.load %arg4[%c0_10, %c0_11, %c0_12] : memref<9x1x128xf32, #tpu.memory_space<vmem>>, vector<1x1x128xf32>
    %12 = vector.shape_cast %11 : vector<1x1x128xf32> to vector<1x128xf32>
    %13 = vector.broadcast %12 : vector<1x128xf32> to vector<8x128xf32>
    %14 = arith.addf %10, %13 : vector<8x128xf32>
    %cst_13 = arith.constant 0.000000e+00 : f32
    %15 = vector.broadcast %cst_13 : f32 to vector<8x128xf32>
    %16 = arith.maximumf %14, %15 : vector<8x128xf32>
    %c1 = arith.constant 1 : index
    %c0_14 = arith.constant 0 : index
    %c0_15 = arith.constant 0 : index
    %17 = vector.load %arg3[%c1, %c0_14, %c0_15] : memref<9x128x128xf32, #tpu.memory_space<vmem>>, vector<1x128x128xf32>
    %18 = vector.shape_cast %17 : vector<1x128x128xf32> to vector<128x128xf32>
    %cst_16 = arith.constant dense<0.000000e+00> : vector<8x128xf32>
    %19 = tpu.matmul %16, %18, %cst_16 {dimension_numbers = #tpu.dot_dimension_numbers<[1], [0], [0], [1], [0, 0, 1, 1], [], []>} : vector<8x128xf32>, vector<128x128xf32>, vector<8x128xf32> -> vector<8x128xf32>
    %c1_17 = arith.constant 1 : index
    %c0_18 = arith.constant 0 : index
    %c0_19 = arith.constant 0 : index
    %20 = vector.load %arg4[%c1_17, %c0_18, %c0_19] : memref<9x1x128xf32, #tpu.memory_space<vmem>>, vector<1x1x128xf32>
    %21 = vector.shape_cast %20 : vector<1x1x128xf32> to vector<1x128xf32>
    %22 = vector.broadcast %21 : vector<1x128xf32> to vector<8x128xf32>
    %23 = arith.addf %19, %22 : vector<8x128xf32>
    %cst_20 = arith.constant 0.000000e+00 : f32
    %24 = vector.broadcast %cst_20 : f32 to vector<8x128xf32>
    %25 = arith.maximumf %23, %24 : vector<8x128xf32>
    %c2 = arith.constant 2 : index
    %c0_21 = arith.constant 0 : index
    %c0_22 = arith.constant 0 : index
    %26 = vector.load %arg3[%c2, %c0_21, %c0_22] : memref<9x128x128xf32, #tpu.memory_space<vmem>>, vector<1x128x128xf32>
    %27 = vector.shape_cast %26 : vector<1x128x128xf32> to vector<128x128xf32>
    %cst_23 = arith.constant dense<0.000000e+00> : vector<8x128xf32>
    %28 = tpu.matmul %25, %27, %cst_23 {dimension_numbers = #tpu.dot_dimension_numbers<[1], [0], [0], [1], [0, 0, 1, 1], [], []>} : vector<8x128xf32>, vector<128x128xf32>, vector<8x128xf32> -> vector<8x128xf32>
    %c2_24 = arith.constant 2 : index
    %c0_25 = arith.constant 0 : index
    %c0_26 = arith.constant 0 : index
    %29 = vector.load %arg4[%c2_24, %c0_25, %c0_26] : memref<9x1x128xf32, #tpu.memory_space<vmem>>, vector<1x1x128xf32>
    %30 = vector.shape_cast %29 : vector<1x1x128xf32> to vector<1x128xf32>
    %31 = vector.broadcast %30 : vector<1x128xf32> to vector<8x128xf32>
    %32 = arith.addf %28, %31 : vector<8x128xf32>
    %cst_27 = arith.constant 0.000000e+00 : f32
    %33 = vector.broadcast %cst_27 : f32 to vector<8x128xf32>
    %34 = arith.maximumf %32, %33 : vector<8x128xf32>
    %c3 = arith.constant 3 : index
    %c0_28 = arith.constant 0 : index
    %c0_29 = arith.constant 0 : index
    %35 = vector.load %arg3[%c3, %c0_28, %c0_29] : memref<9x128x128xf32, #tpu.memory_space<vmem>>, vector<1x128x128xf32>
    %36 = vector.shape_cast %35 : vector<1x128x128xf32> to vector<128x128xf32>
    %cst_30 = arith.constant dense<0.000000e+00> : vector<8x128xf32>
    %37 = tpu.matmul %34, %36, %cst_30 {dimension_numbers = #tpu.dot_dimension_numbers<[1], [0], [0], [1], [0, 0, 1, 1], [], []>} : vector<8x128xf32>, vector<128x128xf32>, vector<8x128xf32> -> vector<8x128xf32>
    %c3_31 = arith.constant 3 : index
    %c0_32 = arith.constant 0 : index
    %c0_33 = arith.constant 0 : index
    %38 = vector.load %arg4[%c3_31, %c0_32, %c0_33] : memref<9x1x128xf32, #tpu.memory_space<vmem>>, vector<1x1x128xf32>
    %39 = vector.shape_cast %38 : vector<1x1x128xf32> to vector<1x128xf32>
    %40 = vector.broadcast %39 : vector<1x128xf32> to vector<8x128xf32>
    %41 = arith.addf %37, %40 : vector<8x128xf32>
    %cst_34 = arith.constant 0.000000e+00 : f32
    %42 = vector.broadcast %cst_34 : f32 to vector<8x128xf32>
    %43 = arith.maximumf %41, %42 : vector<8x128xf32>
    %c4 = arith.constant 4 : index
    %c0_35 = arith.constant 0 : index
    %c0_36 = arith.constant 0 : index
    %44 = vector.load %arg3[%c4, %c0_35, %c0_36] : memref<9x128x128xf32, #tpu.memory_space<vmem>>, vector<1x128x128xf32>
    %45 = vector.shape_cast %44 : vector<1x128x128xf32> to vector<128x128xf32>
    %cst_37 = arith.constant dense<0.000000e+00> : vector<8x128xf32>
    %46 = tpu.matmul %43, %45, %cst_37 {dimension_numbers = #tpu.dot_dimension_numbers<[1], [0], [0], [1], [0, 0, 1, 1], [], []>} : vector<8x128xf32>, vector<128x128xf32>, vector<8x128xf32> -> vector<8x128xf32>
    %c4_38 = arith.constant 4 : index
    %c0_39 = arith.constant 0 : index
    %c0_40 = arith.constant 0 : index
    %47 = vector.load %arg4[%c4_38, %c0_39, %c0_40] : memref<9x1x128xf32, #tpu.memory_space<vmem>>, vector<1x1x128xf32>
    %48 = vector.shape_cast %47 : vector<1x1x128xf32> to vector<1x128xf32>
    %49 = vector.broadcast %48 : vector<1x128xf32> to vector<8x128xf32>
    %50 = arith.addf %46, %49 : vector<8x128xf32>
    %cst_41 = arith.constant 0.000000e+00 : f32
    %51 = vector.broadcast %cst_41 : f32 to vector<8x128xf32>
    %52 = arith.maximumf %50, %51 : vector<8x128xf32>
    %c5 = arith.constant 5 : index
    %c0_42 = arith.constant 0 : index
    %c0_43 = arith.constant 0 : index
    %53 = vector.load %arg3[%c5, %c0_42, %c0_43] : memref<9x128x128xf32, #tpu.memory_space<vmem>>, vector<1x128x128xf32>
    %54 = vector.shape_cast %53 : vector<1x128x128xf32> to vector<128x128xf32>
    %cst_44 = arith.constant dense<0.000000e+00> : vector<8x128xf32>
    %55 = tpu.matmul %52, %54, %cst_44 {dimension_numbers = #tpu.dot_dimension_numbers<[1], [0], [0], [1], [0, 0, 1, 1], [], []>} : vector<8x128xf32>, vector<128x128xf32>, vector<8x128xf32> -> vector<8x128xf32>
    %c5_45 = arith.constant 5 : index
    %c0_46 = arith.constant 0 : index
    %c0_47 = arith.constant 0 : index
    %56 = vector.load %arg4[%c5_45, %c0_46, %c0_47] : memref<9x1x128xf32, #tpu.memory_space<vmem>>, vector<1x1x128xf32>
    %57 = vector.shape_cast %56 : vector<1x1x128xf32> to vector<1x128xf32>
    %58 = vector.broadcast %57 : vector<1x128xf32> to vector<8x128xf32>
    %59 = arith.addf %55, %58 : vector<8x128xf32>
    %cst_48 = arith.constant 0.000000e+00 : f32
    %60 = vector.broadcast %cst_48 : f32 to vector<8x128xf32>
    %61 = arith.maximumf %59, %60 : vector<8x128xf32>
    %c6 = arith.constant 6 : index
    %c0_49 = arith.constant 0 : index
    %c0_50 = arith.constant 0 : index
    %62 = vector.load %arg3[%c6, %c0_49, %c0_50] : memref<9x128x128xf32, #tpu.memory_space<vmem>>, vector<1x128x128xf32>
    %63 = vector.shape_cast %62 : vector<1x128x128xf32> to vector<128x128xf32>
    %cst_51 = arith.constant dense<0.000000e+00> : vector<8x128xf32>
    %64 = tpu.matmul %61, %63, %cst_51 {dimension_numbers = #tpu.dot_dimension_numbers<[1], [0], [0], [1], [0, 0, 1, 1], [], []>} : vector<8x128xf32>, vector<128x128xf32>, vector<8x128xf32> -> vector<8x128xf32>
    %c6_52 = arith.constant 6 : index
    %c0_53 = arith.constant 0 : index
    %c0_54 = arith.constant 0 : index
    %65 = vector.load %arg4[%c6_52, %c0_53, %c0_54] : memref<9x1x128xf32, #tpu.memory_space<vmem>>, vector<1x1x128xf32>
    %66 = vector.shape_cast %65 : vector<1x1x128xf32> to vector<1x128xf32>
    %67 = vector.broadcast %66 : vector<1x128xf32> to vector<8x128xf32>
    %68 = arith.addf %64, %67 : vector<8x128xf32>
    %cst_55 = arith.constant 0.000000e+00 : f32
    %69 = vector.broadcast %cst_55 : f32 to vector<8x128xf32>
    %70 = arith.maximumf %68, %69 : vector<8x128xf32>
    %c7 = arith.constant 7 : index
    %c0_56 = arith.constant 0 : index
    %c0_57 = arith.constant 0 : index
    %71 = vector.load %arg3[%c7, %c0_56, %c0_57] : memref<9x128x128xf32, #tpu.memory_space<vmem>>, vector<1x128x128xf32>
    %72 = vector.shape_cast %71 : vector<1x128x128xf32> to vector<128x128xf32>
    %cst_58 = arith.constant dense<0.000000e+00> : vector<8x128xf32>
    %73 = tpu.matmul %70, %72, %cst_58 {dimension_numbers = #tpu.dot_dimension_numbers<[1], [0], [0], [1], [0, 0, 1, 1], [], []>} : vector<8x128xf32>, vector<128x128xf32>, vector<8x128xf32> -> vector<8x128xf32>
    %c7_59 = arith.constant 7 : index
    %c0_60 = arith.constant 0 : index
    %c0_61 = arith.constant 0 : index
    %74 = vector.load %arg4[%c7_59, %c0_60, %c0_61] : memref<9x1x128xf32, #tpu.memory_space<vmem>>, vector<1x1x128xf32>
    %75 = vector.shape_cast %74 : vector<1x1x128xf32> to vector<1x128xf32>
    %76 = vector.broadcast %75 : vector<1x128xf32> to vector<8x128xf32>
    %77 = arith.addf %73, %76 : vector<8x128xf32>
    %cst_62 = arith.constant 0.000000e+00 : f32
    %78 = vector.broadcast %cst_62 : f32 to vector<8x128xf32>
    %79 = arith.maximumf %77, %78 : vector<8x128xf32>
    %c8 = arith.constant 8 : index
    %c0_63 = arith.constant 0 : index
    %c0_64 = arith.constant 0 : index
    %80 = vector.load %arg3[%c8, %c0_63, %c0_64] : memref<9x128x128xf32, #tpu.memory_space<vmem>>, vector<1x128x128xf32>
    %81 = vector.shape_cast %80 : vector<1x128x128xf32> to vector<128x128xf32>
    %cst_65 = arith.constant dense<0.000000e+00> : vector<8x128xf32>
    %82 = tpu.matmul %79, %81, %cst_65 {dimension_numbers = #tpu.dot_dimension_numbers<[1], [0], [0], [1], [0, 0, 1, 1], [], []>} : vector<8x128xf32>, vector<128x128xf32>, vector<8x128xf32> -> vector<8x128xf32>
    %c8_66 = arith.constant 8 : index
    %c0_67 = arith.constant 0 : index
    %c0_68 = arith.constant 0 : index
    %83 = vector.load %arg4[%c8_66, %c0_67, %c0_68] : memref<9x1x128xf32, #tpu.memory_space<vmem>>, vector<1x1x128xf32>
    %84 = vector.shape_cast %83 : vector<1x1x128xf32> to vector<1x128xf32>
    %85 = vector.broadcast %84 : vector<1x128xf32> to vector<8x128xf32>
    %86 = arith.addf %82, %85 : vector<8x128xf32>
    %cst_69 = arith.constant 0.000000e+00 : f32
    %87 = vector.broadcast %cst_69 : f32 to vector<8x128xf32>
    %88 = arith.maximumf %86, %87 : vector<8x128xf32>
    %c0_70 = arith.constant 0 : index
    %c0_71 = arith.constant 0 : index
    %89 = vector.load %arg5[%c0_70, %c0_71] : memref<128x128xf32, #tpu.memory_space<vmem>>, vector<128x128xf32>
    %cst_72 = arith.constant dense<0.000000e+00> : vector<8x128xf32>
    %90 = tpu.matmul %88, %89, %cst_72 {dimension_numbers = #tpu.dot_dimension_numbers<[1], [0], [0], [1], [0, 0, 1, 1], [], []>} : vector<8x128xf32>, vector<128x128xf32>, vector<8x128xf32> -> vector<8x128xf32>
    %c0_73 = arith.constant 0 : index
    %c0_74 = arith.constant 0 : index
    %91 = vector.load %arg6[%c0_73, %c0_74] : memref<1x128xf32, #tpu.memory_space<vmem>>, vector<1x128xf32>
    %92 = vector.broadcast %91 : vector<1x128xf32> to vector<8x128xf32>
    %93 = arith.addf %90, %92 : vector<8x128xf32>
    %c0_75 = arith.constant 0 : index
    %c0_76 = arith.constant 0 : index
    %94 = vector.load %arg7[%c0_75, %c0_76] : memref<8x128xf32, #tpu.memory_space<vmem>>, vector<8x128xf32>
    tpu.vector_store %arg7[%c0_75, %c0_76], %93 {strides = array<i32>} : memref<8x128xf32, #tpu.memory_space<vmem>>, vector<8x128xf32>,
    return
  }
}

</mosaic_0001>

<bundles_post_ra>
// kernel: _deepnn_forward_impl.1
= control target key start
LH: loop header
LB: loop body
LE: loop exit
PB: predicated region body
PF: predicated region fallthrough
CT: control target
= control target key end

     0   :  { %12 = vsyncpa [#allocation3], 0  ;;  %s839_s0 = inlined_call_operand.hbm [shape: f32[8,32], index: 0, kind: input, shape index: {}]   ;;  %s840_s1 = inlined_call_operand.hbm [shape: f32[32,128], index: 1, kind: input, shape index: {}]   ;;  %s841_s2 = inlined_call_operand.vmem [shape: f32[1,128], index: 2, kind: input, shape index: {}]   ;;  %s842_s3 = inlined_call_operand.hbm [shape: f32[9,128,128], index: 3, kind: input, shape index: {}]   ;;  %s843_s4 = inlined_call_operand.hbm [shape: f32[9,1,128], index: 4, kind: input, shape index: {}]   ;;  %s844_s5 = inlined_call_operand.hbm [shape: f32[128,128], index: 5, kind: input, shape index: {}]   ;;  %s845_s6 = inlined_call_operand.vmem [shape: f32[1,128], index: 6, kind: input, shape index: {}]   ;;  %s846_s7 = inlined_call_operand.hbm [shape: f32[8,128], index: 7, kind: output, shape index: {}]  }
   0x1   :  { %13 = vsyncpa [#allocation6], 0 }
   0x2   :  { %14 = vsyncpa [#allocation9], 0  ;;  %s31_s26 = sshll.u32 %s840_s1, 4  ;;  %s32_s26 = int_to_ptr.hbm [resolvable:$true] %s31_s26 }
   0x3   :  { %15 = vsyncpa [#allocation4], 0  ;;  %s756_s27 = smov [#allocation5]   ;;  %s59_s8 = sshll.u32 %s843_s4, 4  ;;  %s60_s8 = int_to_ptr.hbm [resolvable:$true] %s59_s8 }
   0x4   :  { %s33_s28 = sshll.u32 %s756_s27, 4  ;;  %s757_s9 = smov 128   ;;  %s34_s28 = int_to_ptr.vmem [resolvable:$true] %s33_s28 }
   0x5   :  { %s758_s10 = smov 8   ;;  %s759_s11 = smov [#allocation8]  }
   0x6   :  { %39 = dma.hbm_to_vmem [thread:$0]  %s32_s26, 512, %s34_s28, [#allocation6], %s757_s9, %s757_s9, %s758_s10  }
   0x7   :  { %s61_s12 = sshll.u32 %s759_s11, 4  ;;  %s760_s1 = smov 16   ;;  %s62_s12 = int_to_ptr.vmem [resolvable:$true] %s61_s12 }
   0x8   :  { %s761_s13 = smov 1   ;;  %s21_s16 = sshll.u32 %s839_s0, 4  ;;  %s22_s16 = int_to_ptr.hbm [resolvable:$true] %s21_s16 }
   0x9   :  { %67 = dma.hbm_to_vmem [thread:$0]  %s60_s8, 144, %s62_s12, [#allocation9], %s760_s1, %s760_s1, %s761_s13  }
   0xa   :  { %s762_s17 = smov [#allocation2]   ;;  %s46_s20 = sshll.u32 %s842_s3, 4  ;;  %s47_s20 = int_to_ptr.hbm [resolvable:$true] %s46_s20 }
   0xb   :  { %s23_s4 = sshll.u32 %s762_s17, 4  ;;  %s763_s21 = smov [#allocation7]   ;;  %s24_s4 = int_to_ptr.vmem [resolvable:$true] %s23_s4 }
   0xc   :  { %26 = dma.hbm_to_vmem [thread:$0]  %s22_s16, 128, %s24_s4, [#allocation3]  }
   0xd   :  { %s48_s22 = sshll.u32 %s763_s21, 4  ;;  %s72_s25 = sshll.u32 %s844_s5, 4  ;;  %s49_s22 = int_to_ptr.vmem [resolvable:$true] %s48_s22  ;;  %s73_s25 = int_to_ptr.hbm [resolvable:$true] %s72_s25 }
   0xe   :  { %54 = dma.hbm_to_vmem [thread:$0]  %s47_s20, 18432, %s49_s22, [#allocation6], %s757_s9, %s757_s9, %s758_s10  }
   0xf   :  { %s764_s0 = smov [#allocation10]  }
  0x10   :  { %s74_s26 = sshll.u32 %s764_s0, 4  ;;  %s75_s26 = int_to_ptr.vmem [resolvable:$true] %s74_s26 }
  0x11   :  { %80 = dma.hbm_to_vmem [thread:$0]  %s73_s25, 2048, %s75_s26, [#allocation9], %s757_s9, %s757_s9, %s758_s10  }
  0x12   :  { %748 = dma.done.wait [#allocation3], 128  }
  0x13   :  { %749 = vsyncadd [#allocation3], 4294967168 }
  0x14   :  { %750 = dma.done.wait [#allocation6], 18944  }
  0x15   :  { %751 = vsyncadd [#allocation6], 4294948352 }
  0x16   :  { %752 = dma.done.wait [#allocation9], 2192  }
  0x17   :  { %753 = vsyncadd [#allocation9], 4294965104  ;;  %v107_v0 = vld [vmem:[#allocation5 + $0x18] sm:$0xff]  ;;  %v106_v1 = vld [vmem:[#allocation5 + $0x10] sm:$0xff]  ;;  %vm112_vm0 = vcmask 261120   ;;  %s765_s28 = smov [#allocation11]  }
  0x18   :  { %128 = vmatpush.msra.mxu0 %v107_v0  ;;  %v152_v2 = vld [vmem:[#allocation7 + $0x78] sm:$0xff]  ;;  %v105_v3 = vld [vmem:[#allocation5 + $0x8] sm:$0xff]  ;;  %v151_v4 = vld [vmem:[#allocation7 + $0x70] sm:$0xff]  ;;  %s568_s29 = sshll.u32 %s765_s28, 4  ;;  %s570_s9 = sshll.u32 %s846_s7, 4  ;;  %s569_s29 = int_to_ptr.vmem [resolvable:$true] %s568_s29  ;;  %s571_s9 = int_to_ptr.hbm [resolvable:$true] %s570_s9 }
  0x19   :  { %157 = vmatpush.msra.mxu1 %v152_v2  ;;  %v150_v5 = vld [vmem:[#allocation7 + $0x68] sm:$0xff]  ;;  %v104_v6 = vld [vmem:[#allocation5] sm:$0xff]  ;;  %v103_v7 = vld [vmem:[#allocation2] sm:$0xff] }
  0x1a   :  { %129 = vmatpush.msra.mxu0 %v106_v1  ;;  %v149_v8 = vld [vmem:[#allocation7 + $0x60] sm:$0xff]  ;;  %v148_v9 = vld [vmem:[#allocation7 + $0x58] sm:$0xff]  ;;  %v147_v10 = vld [vmem:[#allocation7 + $0x50] sm:$0xff] }
  0x1b   :  { %158 = vmatpush.msra.mxu1 %v151_v4  ;;  %v146_v11 = vld [vmem:[#allocation7 + $0x48] sm:$0xff]  ;;  %v145_v12 = vld [vmem:[#allocation7 + $0x40] sm:$0xff]  ;;  %v144_v13 = vld [vmem:[#allocation7 + $0x38] sm:$0xff] }
  0x1c   :  { %130 = vmatpush.msra.mxu0 %v105_v3  ;;  %v143_v14 = vld [vmem:[#allocation7 + $0x30] sm:$0xff]  ;;  %v142_v15 = vld [vmem:[#allocation7 + $0x28] sm:$0xff]  ;;  %v141_v16 = vld [vmem:[#allocation7 + $0x20] sm:$0xff] }
  0x1d   :  { %159 = vmatpush.msra.mxu1 %v150_v5  ;;  %v140_v17 = vld [vmem:[#allocation7 + $0x18] sm:$0xff]  ;;  %v139_v18 = vld [vmem:[#allocation7 + $0x10] sm:$0xff]  ;;  %v138_v19 = vld [vmem:[#allocation7 + $0x8] sm:$0xff] }
  0x1e   :  { %131 = vmatpush.msra.mxu0 %v104_v6  ;;  %v137_v20 = vld [vmem:[#allocation7] sm:$0xff]  ;;  %v194_v21 = vld [vmem:[#allocation7 + $0xf8] sm:$0xff]  ;;  %v193_v22 = vld [vmem:[#allocation7 + $0xf0] sm:$0xff] }
  0x1f   :  { %582 = vmatmul.msk.f32.vlgmr.msra.gmra.mxu0 %vm112_vm0, %v103_v7  ;;  %160 = vmatpush.msra.mxu1 %v149_v8  ;;  %v192_v23 = vld [vmem:[#allocation7 + $0xe8] sm:$0xff]  ;;  %v191_v24 = vld [vmem:[#allocation7 + $0xe0] sm:$0xff]  ;;  %v190_v25 = vld [vmem:[#allocation7 + $0xd8] sm:$0xff] }
  0x20   :  { %200 = vmatpush.msra.mxu2 %v194_v21  ;;  %v189_v26 = vld [vmem:[#allocation7 + $0xd0] sm:$0xff]  ;;  %v188_v27 = vld [vmem:[#allocation7 + $0xc8] sm:$0xff]  ;;  %v187_v28 = vld [vmem:[#allocation7 + $0xc0] sm:$0xff] }
  0x21   :  { %161 = vmatpush.msra.mxu1 %v148_v9  ;;  %v186_v29 = vld [vmem:[#allocation7 + $0xb8] sm:$0xff]  ;;  %v185_v30 = vld [vmem:[#allocation7 + $0xb0] sm:$0xff]  ;;  %v184_v31 = vld [vmem:[#allocation7 + $0xa8] sm:$0xff] }
  0x22   :  { %201 = vmatpush.msra.mxu2 %v193_v22  ;;  %v183_v32 = vld [vmem:[#allocation7 + $0xa0] sm:$0xff]  ;;  %v182_v33 = vld [vmem:[#allocation7 + $0x98] sm:$0xff]  ;;  %v181_v38 = vld [vmem:[#allocation7 + $0x90] sm:$0xff] }
  0x23   :  { %162 = vmatpush.msra.mxu1 %v147_v10  ;;  %v593_v34 = vld [vmem:[%s841_s2] ss:$0 sm:$0xff]  ;;  %v180_v39 = vld [vmem:[#allocation7 + $0x88] sm:$0xff]  ;;  %v179_v40 = vld [vmem:[#allocation7 + $0x80] sm:$0xff] }
  0x24   :  { %202 = vmatpush.msra.mxu2 %v192_v23  ;;  %v237_v41 = vld [vmem:[#allocation7 + $0x178] sm:$0xff]  ;;  %v236_v42 = vld [vmem:[#allocation7 + $0x170] sm:$0xff]  ;;  %v235_v43 = vld [vmem:[#allocation7 + $0x168] sm:$0xff] }
  0x25   :  { %163 = vmatpush.msra.mxu1 %v146_v11  ;;  %243 = vmatpush.msra.mxu3 %v237_v41  ;;  %v234_v44 = vld [vmem:[#allocation7 + $0x160] sm:$0xff]  ;;  %v233_v45 = vld [vmem:[#allocation7 + $0x158] sm:$0xff]  ;;  %v232_v46 = vld [vmem:[#allocation7 + $0x150] sm:$0xff] }
  0x26   :  { %203 = vmatpush.msra.mxu2 %v191_v24  ;;  %v231_v47 = vld [vmem:[#allocation7 + $0x148] sm:$0xff]  ;;  %v230_v48 = vld [vmem:[#allocation7 + $0x140] sm:$0xff]  ;;  %v229_v49 = vld [vmem:[#allocation7 + $0x138] sm:$0xff] }
  0x27   :  { %164 = vmatpush.msra.mxu1 %v145_v12  ;;  %244 = vmatpush.msra.mxu3 %v236_v42  ;;  %v228_v50 = vld [vmem:[#allocation7 + $0x130] sm:$0xff]  ;;  %v227_v51 = vld [vmem:[#allocation7 + $0x128] sm:$0xff]  ;;  %v226_v52 = vld [vmem:[#allocation7 + $0x120] sm:$0xff] }
  0x28   :  { %204 = vmatpush.msra.mxu2 %v190_v25  ;;  %v225_v53 = vld [vmem:[#allocation7 + $0x118] sm:$0xff]  ;;  %v594_v54 = vld [vmem:[#allocation8] ss:$0 sm:$0xff]  ;;  %v224_v58 = vld [vmem:[#allocation7 + $0x110] sm:$0xff] }
  0x29   :  { %165 = vmatpush.msra.mxu1 %v144_v13  ;;  %245 = vmatpush.msra.mxu3 %v235_v43  ;;  %v223_v59 = vld [vmem:[#allocation7 + $0x108] sm:$0xff]  ;;  %v222_v60 = vld [vmem:[#allocation7 + $0x100] sm:$0xff]  ;;  %v280_v61 = vld [vmem:[#allocation7 + $0x1f8] sm:$0xff] }
  0x2a   :  { %205 = vmatpush.msra.mxu2 %v189_v26  ;;  %v279_v62 = vld [vmem:[#allocation7 + $0x1f0] sm:$0xff]  ;;  %286 = vmatpush.msrb.mxu0 %v280_v61  ;;  %v278_v63 = vld [vmem:[#allocation7 + $0x1e8] sm:$0xff]  ;;  %v277_v0 = vld [vmem:[#allocation7 + $0x1e0] sm:$0xff] }
  0x2b   :  { %166 = vmatpush.msra.mxu1 %v143_v14  ;;  %246 = vmatpush.msra.mxu3 %v234_v44  ;;  %v276_v1 = vld [vmem:[#allocation7 + $0x1d8] sm:$0xff]  ;;  %v275_v2 = vld [vmem:[#allocation7 + $0x1d0] sm:$0xff]  ;;  %v274_v3 = vld [vmem:[#allocation7 + $0x1c8] sm:$0xff] }
  0x2c   :  { %206 = vmatpush.msra.mxu2 %v188_v27  ;;  %287 = vmatpush.msrb.mxu0 %v279_v62  ;;  %v273_v4 = vld [vmem:[#allocation7 + $0x1c0] sm:$0xff]  ;;  %v272_v5 = vld [vmem:[#allocation7 + $0x1b8] sm:$0xff]  ;;  %v271_v6 = vld [vmem:[#allocation7 + $0x1b0] sm:$0xff] }
  0x2d   :  { %167 = vmatpush.msra.mxu1 %v142_v15  ;;  %247 = vmatpush.msra.mxu3 %v233_v45  ;;  %v270_v7 = vld [vmem:[#allocation7 + $0x1a8] sm:$0xff]  ;;  %v269_v8 = vld [vmem:[#allocation7 + $0x1a0] sm:$0xff]  ;;  %v268_v9 = vld [vmem:[#allocation7 + $0x198] sm:$0xff] }
  0x2e   :  { %207 = vmatpush.msra.mxu2 %v187_v28  ;;  %288 = vmatpush.msrb.mxu0 %v278_v63  ;;  %v595_v10 = vld [vmem:[#allocation8 + $0x1] ss:$0 sm:$0xff]  ;;  %v267_v14 = vld [vmem:[#allocation7 + $0x190] sm:$0xff]  ;;  %v266_v15 = vld [vmem:[#allocation7 + $0x188] sm:$0xff] }
  0x2f   :  { %168 = vmatpush.msra.mxu1 %v141_v16  ;;  %248 = vmatpush.msra.mxu3 %v232_v46  ;;  %v265_v16 = vld [vmem:[#allocation7 + $0x180] sm:$0xff]  ;;  %v319_v21 = vld [vmem:[#allocation7 + $0x258] sm:$0xff]  ;;  %v318_v22 = vld [vmem:[#allocation7 + $0x250] sm:$0xff] }
  0x30   :  { %208 = vmatpush.msra.mxu2 %v186_v29  ;;  %289 = vmatpush.msrb.mxu0 %v277_v0  ;;  %v317_v23 = vld [vmem:[#allocation7 + $0x248] sm:$0xff]  ;;  %v316_v24 = vld [vmem:[#allocation7 + $0x240] sm:$0xff]  ;;  %v315_v25 = vld [vmem:[#allocation7 + $0x238] sm:$0xff] }
  0x31   :  { %169 = vmatpush.msra.mxu1 %v140_v17  ;;  %249 = vmatpush.msra.mxu3 %v231_v47  ;;  %v323_v17 = vld [vmem:[#allocation7 + $0x278] sm:$0xff]  ;;  %v314_v26 = vld [vmem:[#allocation7 + $0x230] sm:$0xff]  ;;  %v313_v27 = vld [vmem:[#allocation7 + $0x228] sm:$0xff] }
  0x32   :  { %209 = vmatpush.msra.mxu2 %v185_v30  ;;  %290 = vmatpush.msrb.mxu0 %v276_v1  ;;  %v312_v28 = vld [vmem:[#allocation7 + $0x220] sm:$0xff]  ;;  %v311_v29 = vld [vmem:[#allocation7 + $0x218] sm:$0xff]  ;;  %v361_v42 = vld [vmem:[#allocation7 + $0x2d0] sm:$0xff] }
  0x33   :  { %170 = vmatpush.msra.mxu1 %v139_v18  ;;  %250 = vmatpush.msra.mxu3 %v230_v48  ;;  %v322_v18 = vld [vmem:[#allocation7 + $0x270] sm:$0xff]  ;;  %v596_v30 = vld [vmem:[#allocation8 + $0x2] ss:$0 sm:$0xff]  ;;  %v362_v41 = vld [vmem:[#allocation7 + $0x2d8] sm:$0xff] }
  0x34   :  { %210 = vmatpush.msra.mxu2 %v184_v31  ;;  %291 = vmatpush.msrb.mxu0 %v275_v2  ;;  %v360_v43 = vld [vmem:[#allocation7 + $0x2c8] sm:$0xff]  ;;  %v359_v44 = vld [vmem:[#allocation7 + $0x2c0] sm:$0xff]  ;;  %v358_v45 = vld [vmem:[#allocation7 + $0x2b8] sm:$0xff] }
  0x35   :  { %171 = vmatpush.msra.mxu1 %v138_v19  ;;  %251 = vmatpush.msra.mxu3 %v229_v49  ;;  %v321_v19 = vld [vmem:[#allocation7 + $0x268] sm:$0xff]  ;;  %v357_v46 = vld [vmem:[#allocation7 + $0x2b0] sm:$0xff]  ;;  %v355_v48 = vld [vmem:[#allocation7 + $0x2a0] sm:$0xff] }
  0x36   :  { %211 = vmatpush.msra.mxu2 %v183_v32  ;;  %292 = vmatpush.msrb.mxu0 %v274_v3  ;;  %v356_v47 = vld [vmem:[#allocation7 + $0x2a8] sm:$0xff]  ;;  %v354_v49 = vld [vmem:[#allocation7 + $0x298] sm:$0xff]  ;;  %v404_v62 = vld [vmem:[#allocation7 + $0x350] sm:$0xff] }
  0x37   :  { %172 = vmatpush.msra.mxu1 %v137_v20  ;;  %252 = vmatpush.msra.mxu3 %v228_v50  ;;  %v320_v20 = vld [vmem:[#allocation7 + $0x260] sm:$0xff]  ;;  %v405_v61 = vld [vmem:[#allocation7 + $0x358] sm:$0xff]  ;;  %v403_v63 = vld [vmem:[#allocation7 + $0x348] sm:$0xff] }
  0x38   :  { %212 = vmatpush.msra.mxu2 %v182_v33  ;;  %293 = vmatpush.msrb.mxu0 %v273_v4  ;;  %v597_v50 = vld [vmem:[#allocation8 + $0x3] ss:$0 sm:$0xff]  ;;  %v401_v1 = vld [vmem:[#allocation7 + $0x338] sm:$0xff]  ;;  %v400_v2 = vld [vmem:[#allocation7 + $0x330] sm:$0xff] }
  0x39   :  { %253 = vmatpush.msra.mxu3 %v227_v51  ;;  %329 = vmatpush.msrb.mxu1 %v323_v17  ;;  %v402_v0 = vld [vmem:[#allocation7 + $0x340] sm:$0xff]  ;;  %v399_v3 = vld [vmem:[#allocation7 + $0x328] sm:$0xff]  ;;  %v448_v17 = vld [vmem:[#allocation7 + $0x3d8] sm:$0xff] }
  0x3a   :  { %213 = vmatpush.msra.mxu2 %v181_v38  ;;  %294 = vmatpush.msrb.mxu0 %v272_v5  ;;  %v365_v38 = vld [vmem:[#allocation7 + $0x2f0] sm:$0xff]  ;;  %v398_v4 = vld [vmem:[#allocation7 + $0x320] sm:$0xff]  ;;  %v397_v5 = vld [vmem:[#allocation7 + $0x318] sm:$0xff] }
  0x3b   :  { %254 = vmatpush.msra.mxu3 %v226_v52  ;;  %330 = vmatpush.msrb.mxu1 %v322_v18  ;;  %v447_v18 = vld [vmem:[#allocation7 + $0x3d0] sm:$0xff] }
  0x3c   :  { %214 = vmatpush.msra.mxu2 %v180_v39  ;;  %295 = vmatpush.msrb.mxu0 %v271_v6  ;;  %v364_v39 = vld [vmem:[#allocation7 + $0x2e8] sm:$0xff]  ;;  %v598_v6 = vld [vmem:[#allocation8 + $0x4] ss:$0 sm:$0xff] }
  0x3d   :  { %255 = vmatpush.msra.mxu3 %v225_v53  ;;  %331 = vmatpush.msrb.mxu1 %v321_v19  ;;  %v446_v19 = vld [vmem:[#allocation7 + $0x3c8] sm:$0xff] }
  0x3e   :  { %215 = vmatpush.msra.mxu2 %v179_v40  ;;  %296 = vmatpush.msrb.mxu0 %v270_v7  ;;  %v363_v40 = vld [vmem:[#allocation7 + $0x2e0] sm:$0xff] }
  0x3f   :  { %256 = vmatpush.msra.mxu3 %v224_v58  ;;  %332 = vmatpush.msrb.mxu1 %v320_v20  ;;  %v408_v58 = vld [vmem:[#allocation7 + $0x370] sm:$0xff]  ;;  %v445_v20 = vld [vmem:[#allocation7 + $0x3c0] sm:$0xff] }
  0x40   :  { %297 = vmatpush.msrb.mxu0 %v269_v8 }
  0x41   :  { %257 = vmatpush.msra.mxu3 %v223_v59  ;;  %333 = vmatpush.msrb.mxu1 %v319_v21  ;;  %v407_v59 = vld [vmem:[#allocation7 + $0x368] sm:$0xff]  ;;  %v444_v21 = vld [vmem:[#allocation7 + $0x3b8] sm:$0xff] }
  0x42   :  { %298 = vmatpush.msrb.mxu0 %v268_v9 }
  0x43   :  { %258 = vmatpush.msra.mxu3 %v222_v60  ;;  %334 = vmatpush.msrb.mxu1 %v318_v22  ;;  %v406_v60 = vld [vmem:[#allocation7 + $0x360] sm:$0xff]  ;;  %v443_v22 = vld [vmem:[#allocation7 + $0x3b0] sm:$0xff] }
  0x44   :  { %299 = vmatpush.msrb.mxu0 %v267_v14  ;;  %v451_v14 = vld [vmem:[#allocation7 + $0x3f0] sm:$0xff] }
  0x45   :  { %335 = vmatpush.msrb.mxu1 %v317_v23  ;;  %v442_v23 = vld [vmem:[#allocation7 + $0x3a8] sm:$0xff] }
  0x46   :  { %300 = vmatpush.msrb.mxu0 %v266_v15  ;;  %v450_v15 = vld [vmem:[#allocation7 + $0x3e8] sm:$0xff] }
  0x47   :  { %336 = vmatpush.msrb.mxu1 %v316_v24  ;;  %v441_v24 = vld [vmem:[#allocation7 + $0x3a0] sm:$0xff] }
  0x48   :  { %301 = vmatpush.msrb.mxu0 %v265_v16  ;;  %v449_v16 = vld [vmem:[#allocation7 + $0x3e0] sm:$0xff] }
  0x49   :  { %337 = vmatpush.msrb.mxu1 %v315_v25  ;;  %v440_v25 = vld [vmem:[#allocation7 + $0x398] sm:$0xff] }
  0x4b   :  { %338 = vmatpush.msrb.mxu1 %v314_v26  ;;  %v599_v26 = vld [vmem:[#allocation8 + $0x5] ss:$0 sm:$0xff] }
  0x4d   :  { %339 = vmatpush.msrb.mxu1 %v313_v27 }
  0x4f   :  { %340 = vmatpush.msrb.mxu1 %v312_v28 }
  0x51   :  { %341 = vmatpush.msrb.mxu1 %v311_v29 }
  0x9c   :  { %v133_v35 = vpop.f32.mrf.mxu0 }
  0x9d   :  { %v134_v36 = vadd.f32 %v593_v34, %v133_v35  ;;  %v310_v34 = vld [vmem:[#allocation7 + $0x210] sm:$0xff]  ;;  %v309_v35 = vld [vmem:[#allocation7 + $0x208] sm:$0xff] }
  0x9e   :  { %342 = vmatpush.msrb.mxu1 %v310_v34  ;;  %v494_v34 = vld [vmem:[#allocation7 + $0x470] sm:$0xff] }
  0x9f   :  { %v136_v37 = vmax.f32 %v134_v36, 0.0  ;;  %v308_v36 = vld [vmem:[#allocation7 + $0x200] sm:$0xff] }
  0xa0   :  { %343 = vmatpush.msrb.mxu1 %v309_v35  ;;  %v493_v35 = vld [vmem:[#allocation7 + $0x468] sm:$0xff] }
  0xa1   :  { %173 = vmatmul.f32.vlgmr.msra.gmra.mxu1 %v136_v37  ;;  %v366_v37 = vld [vmem:[#allocation7 + $0x2f8] sm:$0xff] }
  0xa2   :  { %344 = vmatpush.msrb.mxu1 %v308_v36  ;;  %372 = vmatpush.msrb.mxu2 %v366_v37  ;;  %v492_v36 = vld [vmem:[#allocation7 + $0x460] sm:$0xff]  ;;  %v491_v37 = vld [vmem:[#allocation7 + $0x458] sm:$0xff] }
  0xa4   :  { %373 = vmatpush.msrb.mxu2 %v365_v38  ;;  %v490_v38 = vld [vmem:[#allocation7 + $0x450] sm:$0xff] }
  0xa6   :  { %374 = vmatpush.msrb.mxu2 %v364_v39  ;;  %v489_v39 = vld [vmem:[#allocation7 + $0x448] sm:$0xff] }
  0xa8   :  { %375 = vmatpush.msrb.mxu2 %v363_v40  ;;  %v488_v40 = vld [vmem:[#allocation7 + $0x440] sm:$0xff] }
  0xaa   :  { %376 = vmatpush.msrb.mxu2 %v362_v41  ;;  %v487_v41 = vld [vmem:[#allocation7 + $0x438] sm:$0xff] }
  0xac   :  { %377 = vmatpush.msrb.mxu2 %v361_v42  ;;  %v486_v42 = vld [vmem:[#allocation7 + $0x430] sm:$0xff] }
  0xae   :  { %378 = vmatpush.msrb.mxu2 %v360_v43  ;;  %v485_v43 = vld [vmem:[#allocation7 + $0x428] sm:$0xff] }
  0xb0   :  { %379 = vmatpush.msrb.mxu2 %v359_v44  ;;  %v484_v44 = vld [vmem:[#allocation7 + $0x420] sm:$0xff] }
  0xb2   :  { %380 = vmatpush.msrb.mxu2 %v358_v45  ;;  %v483_v45 = vld [vmem:[#allocation7 + $0x418] sm:$0xff] }
  0xb4   :  { %381 = vmatpush.msrb.mxu2 %v357_v46  ;;  %v600_v46 = vld [vmem:[#allocation8 + $0x6] ss:$0 sm:$0xff] }
  0xb6   :  { %382 = vmatpush.msrb.mxu2 %v356_v47 }
  0xb8   :  { %383 = vmatpush.msrb.mxu2 %v355_v48 }
  0xba   :  { %384 = vmatpush.msrb.mxu2 %v354_v49 }
 0x11e   :  { %v174_v55 = vpop.f32.mrf.mxu1 }
 0x11f   :  { %v175_v56 = vadd.f32 %v594_v54, %v174_v55  ;;  %v353_v54 = vld [vmem:[#allocation7 + $0x290] sm:$0xff]  ;;  %v352_v55 = vld [vmem:[#allocation7 + $0x288] sm:$0xff] }
 0x120   :  { %385 = vmatpush.msrb.mxu2 %v353_v54  ;;  %v536_v54 = vld [vmem:[#allocation10 + $0x70] sm:$0xff] }
 0x121   :  { %v177_v57 = vmax.f32 %v175_v56, 0.0  ;;  %v351_v56 = vld [vmem:[#allocation7 + $0x280] sm:$0xff] }
 0x122   :  { %386 = vmatpush.msrb.mxu2 %v352_v55  ;;  %v535_v55 = vld [vmem:[#allocation10 + $0x68] sm:$0xff] }
 0x123   :  { %216 = vmatmul.f32.vlgmr.msra.gmra.mxu2 %v177_v57  ;;  %v409_v57 = vld [vmem:[#allocation7 + $0x378] sm:$0xff] }
 0x124   :  { %387 = vmatpush.msrb.mxu2 %v351_v56  ;;  %415 = vmatpush.msrb.mxu3 %v409_v57  ;;  %v534_v56 = vld [vmem:[#allocation10 + $0x60] sm:$0xff]  ;;  %v533_v57 = vld [vmem:[#allocation10 + $0x58] sm:$0xff] }
 0x126   :  { %416 = vmatpush.msrb.mxu3 %v408_v58  ;;  %v532_v58 = vld [vmem:[#allocation10 + $0x50] sm:$0xff] }
 0x128   :  { %417 = vmatpush.msrb.mxu3 %v407_v59  ;;  %v531_v59 = vld [vmem:[#allocation10 + $0x48] sm:$0xff] }
 0x12a   :  { %418 = vmatpush.msrb.mxu3 %v406_v60  ;;  %v530_v60 = vld [vmem:[#allocation10 + $0x40] sm:$0xff] }
 0x12c   :  { %419 = vmatpush.msrb.mxu3 %v405_v61  ;;  %v529_v61 = vld [vmem:[#allocation10 + $0x38] sm:$0xff] }
 0x12e   :  { %420 = vmatpush.msrb.mxu3 %v404_v62  ;;  %v528_v62 = vld [vmem:[#allocation10 + $0x30] sm:$0xff] }
 0x130   :  { %421 = vmatpush.msrb.mxu3 %v403_v63  ;;  %v527_v63 = vld [vmem:[#allocation10 + $0x28] sm:$0xff] }
 0x132   :  { %422 = vmatpush.msrb.mxu3 %v402_v0  ;;  %v526_v0 = vld [vmem:[#allocation10 + $0x20] sm:$0xff] }
 0x134   :  { %423 = vmatpush.msrb.mxu3 %v401_v1  ;;  %v525_v1 = vld [vmem:[#allocation10 + $0x18] sm:$0xff] }
 0x136   :  { %424 = vmatpush.msrb.mxu3 %v400_v2  ;;  %v601_v2 = vld [vmem:[#allocation8 + $0x7] ss:$0 sm:$0xff] }
 0x138   :  { %425 = vmatpush.msrb.mxu3 %v399_v3 }
 0x13a   :  { %426 = vmatpush.msrb.mxu3 %v398_v4 }
 0x13c   :  { %427 = vmatpush.msrb.mxu3 %v397_v5 }
 0x1a6   :  { %v217_v11 = vpop.f32.mrf.mxu2 }
 0x1a7   :  { %v218_v12 = vadd.f32 %v595_v10, %v217_v11  ;;  %v396_v10 = vld [vmem:[#allocation7 + $0x310] sm:$0xff]  ;;  %v395_v11 = vld [vmem:[#allocation7 + $0x308] sm:$0xff] }
 0x1a8   :  { %428 = vmatpush.msrb.mxu3 %v396_v10 }
 0x1a9   :  { %v220_v13 = vmax.f32 %v218_v12, 0.0  ;;  %v394_v12 = vld [vmem:[#allocation7 + $0x300] sm:$0xff] }
 0x1aa   :  { %429 = vmatpush.msrb.mxu3 %v395_v11 }
 0x1ab   :  { %259 = vmatmul.f32.vlgmr.msra.gmra.mxu3 %v220_v13  ;;  %v452_v13 = vld [vmem:[#allocation7 + $0x3f8] sm:$0xff] }
 0x1ac   :  { %430 = vmatpush.msrb.mxu3 %v394_v12  ;;  %458 = vmatpush.msra.mxu0 %v452_v13  ;;  %v603_v13 = vld [vmem:[%s845_s6] ss:$0 sm:$0xff] }
 0x1ae   :  { %459 = vmatpush.msra.mxu0 %v451_v14 }
 0x1b0   :  { %460 = vmatpush.msra.mxu0 %v450_v15 }
 0x1b2   :  { %461 = vmatpush.msra.mxu0 %v449_v16 }
 0x1b4   :  { %462 = vmatpush.msra.mxu0 %v448_v17 }
 0x1b6   :  { %463 = vmatpush.msra.mxu0 %v447_v18 }
 0x1b8   :  { %464 = vmatpush.msra.mxu0 %v446_v19 }
 0x1ba   :  { %465 = vmatpush.msra.mxu0 %v445_v20 }
 0x1bc   :  { %466 = vmatpush.msra.mxu0 %v444_v21 }
 0x1be   :  { %467 = vmatpush.msra.mxu0 %v443_v22 }
 0x1c0   :  { %468 = vmatpush.msra.mxu0 %v442_v23 }
 0x1c2   :  { %469 = vmatpush.msra.mxu0 %v441_v24 }
 0x1c4   :  { %470 = vmatpush.msra.mxu0 %v440_v25 }
 0x22e   :  { %v260_v31 = vpop.f32.mrf.mxu3 }
 0x22f   :  { %v261_v32 = vadd.f32 %v596_v30, %v260_v31  ;;  %v439_v30 = vld [vmem:[#allocation7 + $0x390] sm:$0xff]  ;;  %v438_v31 = vld [vmem:[#allocation7 + $0x388] sm:$0xff] }
 0x230   :  { %471 = vmatpush.msra.mxu0 %v439_v30 }
 0x231   :  { %v263_v33 = vmax.f32 %v261_v32, 0.0  ;;  %v437_v32 = vld [vmem:[#allocation7 + $0x380] sm:$0xff] }
 0x232   :  { %472 = vmatpush.msra.mxu0 %v438_v31 }
 0x233   :  { %302 = vmatmul.f32.vlgmr.msrb.gmra.mxu0 %v263_v33  ;;  %v495_v33 = vld [vmem:[#allocation7 + $0x478] sm:$0xff] }
 0x234   :  { %473 = vmatpush.msra.mxu0 %v437_v32  ;;  %501 = vmatpush.msra.mxu1 %v495_v33 }
 0x236   :  { %502 = vmatpush.msra.mxu1 %v494_v34 }
 0x238   :  { %503 = vmatpush.msra.mxu1 %v493_v35 }
 0x23a   :  { %504 = vmatpush.msra.mxu1 %v492_v36 }
 0x23c   :  { %505 = vmatpush.msra.mxu1 %v491_v37 }
 0x23e   :  { %506 = vmatpush.msra.mxu1 %v490_v38 }
 0x240   :  { %507 = vmatpush.msra.mxu1 %v489_v39 }
 0x242   :  { %508 = vmatpush.msra.mxu1 %v488_v40 }
 0x244   :  { %509 = vmatpush.msra.mxu1 %v487_v41 }
 0x246   :  { %510 = vmatpush.msra.mxu1 %v486_v42 }
 0x248   :  { %511 = vmatpush.msra.mxu1 %v485_v43 }
 0x24a   :  { %512 = vmatpush.msra.mxu1 %v484_v44 }
 0x24c   :  { %513 = vmatpush.msra.mxu1 %v483_v45 }
 0x2b0   :  { %v303_v51 = vpop.f32.mrf.mxu0 }
 0x2b1   :  { %v304_v52 = vadd.f32 %v597_v50, %v303_v51  ;;  %v482_v50 = vld [vmem:[#allocation7 + $0x410] sm:$0xff]  ;;  %v481_v51 = vld [vmem:[#allocation7 + $0x408] sm:$0xff] }
 0x2b2   :  { %514 = vmatpush.msra.mxu1 %v482_v50 }
 0x2b3   :  { %v306_v53 = vmax.f32 %v304_v52, 0.0  ;;  %v480_v52 = vld [vmem:[#allocation7 + $0x400] sm:$0xff] }
 0x2b4   :  { %515 = vmatpush.msra.mxu1 %v481_v51 }
 0x2b5   :  { %345 = vmatmul.f32.vlgmr.msrb.gmra.mxu1 %v306_v53  ;;  %v537_v53 = vld [vmem:[#allocation10 + $0x78] sm:$0xff] }
 0x2b6   :  { %516 = vmatpush.msra.mxu1 %v480_v52  ;;  %542 = vmatpush.msra.mxu2 %v537_v53 }
 0x2b8   :  { %543 = vmatpush.msra.mxu2 %v536_v54 }
 0x2ba   :  { %544 = vmatpush.msra.mxu2 %v535_v55 }
 0x2bc   :  { %545 = vmatpush.msra.mxu2 %v534_v56 }
 0x2be   :  { %546 = vmatpush.msra.mxu2 %v533_v57 }
 0x2c0   :  { %547 = vmatpush.msra.mxu2 %v532_v58 }
 0x2c2   :  { %548 = vmatpush.msra.mxu2 %v531_v59 }
 0x2c4   :  { %549 = vmatpush.msra.mxu2 %v530_v60 }
 0x2c6   :  { %550 = vmatpush.msra.mxu2 %v529_v61 }
 0x2c8   :  { %551 = vmatpush.msra.mxu2 %v528_v62 }
 0x2ca   :  { %552 = vmatpush.msra.mxu2 %v527_v63 }
 0x2cc   :  { %553 = vmatpush.msra.mxu2 %v526_v0 }
 0x2ce   :  { %554 = vmatpush.msra.mxu2 %v525_v1 }
 0x332   :  { %v346_v7 = vpop.f32.mrf.mxu1 }
 0x333   :  { %v347_v8 = vadd.f32 %v598_v6, %v346_v7  ;;  %v524_v6 = vld [vmem:[#allocation10 + $0x10] sm:$0xff]  ;;  %v523_v7 = vld [vmem:[#allocation10 + $0x8] sm:$0xff] }
 0x334   :  { %555 = vmatpush.msra.mxu2 %v524_v6 }
 0x335   :  { %v349_v9 = vmax.f32 %v347_v8, 0.0  ;;  %v522_v8 = vld [vmem:[#allocation10] sm:$0xff] }
 0x336   :  { %556 = vmatpush.msra.mxu2 %v523_v7 }
 0x337   :  { %388 = vmatmul.f32.vlgmr.msrb.gmra.mxu2 %v349_v9  ;;  %v602_v9 = vld [vmem:[#allocation8 + $0x8] ss:$0 sm:$0xff] }
 0x338   :  { %557 = vmatpush.msra.mxu2 %v522_v8 }
 0x3ba   :  { %v389_v27 = vpop.f32.mrf.mxu2 }
 0x3bb   :  { %v390_v28 = vadd.f32 %v599_v26, %v389_v27 }
 0x3bd   :  { %v392_v29 = vmax.f32 %v390_v28, 0.0 }
 0x3bf   :  { %431 = vmatmul.f32.vlgmr.msrb.gmra.mxu3 %v392_v29 }
 0x442   :  { %v432_v47 = vpop.f32.mrf.mxu3 }
 0x443   :  { %v433_v48 = vadd.f32 %v600_v46, %v432_v47 }
 0x445   :  { %v435_v49 = vmax.f32 %v433_v48, 0.0 }
 0x447   :  { %474 = vmatmul.f32.vlgmr.msra.gmra.mxu0 %v435_v49 }
 0x4c4   :  { %v475_v3 = vpop.f32.mrf.mxu0 }
 0x4c5   :  { %v476_v4 = vadd.f32 %v601_v2, %v475_v3 }
 0x4c7   :  { %v478_v5 = vmax.f32 %v476_v4, 0.0 }
 0x4c9   :  { %517 = vmatmul.f32.vlgmr.msra.gmra.mxu1 %v478_v5 }
 0x546   :  { %v518_v10 = vpop.f32.mrf.mxu1 }
 0x547   :  { %v519_v11 = vadd.f32 %v602_v9, %v518_v10 }
 0x549   :  { %v521_v12 = vmax.f32 %v519_v11, 0.0 }
 0x54b   :  { %558 = vmatmul.f32.vlgmr.msra.gmra.mxu2 %v521_v12 }
 0x5ce   :  { %v559_v14 = vpop.f32.mrf.mxu2 }
 0x5cf   :  { %v560_v15 = vadd.f32 %v603_v13, %v559_v14 }
 0x5d1   :  { %562 = vst [vmem:[#allocation11] sm:$0xff] %v560_v15 }
 0x5d2   :  { %573 = dma.vmem_to_hbm [thread:$0]  %s569_s29, 128, %s571_s9, [#allocation4]  }
 0x5d3   :  { %754 = dma.done.wait [#allocation4], 128  }
 0x5d4   :  { %755 = vsyncadd [#allocation4], 4294967168 }
 0x5d5   :  { %578 = vsyncpa [#allocation3], 1 }
 0x5d6   :  { %579 = vsyncpa [#allocation6], 1 }
 0x5d7   :  { %580 = vsyncpa [#allocation9], 1 }
 0x5d8   :  { %581 = vsyncpa [#allocation4], 1 }

</bundles_post_ra>
